<compile_context>
chip_gen: v5e
topology: v5e:2x2
jax: 0.10.0
libtpu: 0.0.40
codegen_flags: <defaults>
</compile_context>

<pallas_src>
import math

import jax
import jax.numpy as jnp
import numpy as np
from jax.experimental import pallas as pl
from jax.experimental.pallas import tpu as pltpu


def get_rotary_matrix(context_window, embedding_dim):
    """Exactly mirrors the PyTorch reference (including the (i-1) quirk)."""
    R = np.zeros((context_window, embedding_dim, embedding_dim), dtype=np.float32)
    for position in range(context_window):
        for i in range(embedding_dim // 2):
            theta = 10000.0 ** (-2.0 * (i - 1) / embedding_dim)
            m_theta = position * theta
            R[position, 2 * i, 2 * i] = np.cos(m_theta)
            R[position, 2 * i, 2 * i + 1] = -np.sin(m_theta)
            R[position, 2 * i + 1, 2 * i] = np.sin(m_theta)
            R[position, 2 * i + 1, 2 * i + 1] = np.cos(m_theta)
    return R


def _rope_attn_kernel(x_ref, w_ref, cos_ref, sin_ref, bias_ref, o_ref):
    # x_ref:    (bt, m, d)   batch tile of inputs (f32)
    # w_ref:    (d, 3d)      fused bf16 [Wq^T P / sqrt(d) | Wk^T P | Wv^T]
    # cos_ref:  (m, d/2)     cos(p * theta_i) table (f32)
    # sin_ref:  (m, d/2)     sin(p * theta_i) table (f32)
    # bias_ref: (m, m)       additive causal bias (0 / -1e30, f32)
    # o_ref:    (bt, m*d)    lane-dense output tile
    bt, m, d = x_ref.shape
    h = d // 2

    # Single fused projection: one wide bf16 MXU matmul, f32 accumulation.
    xs = x_ref[...].reshape(bt * m, d).astype(jnp.bfloat16)
    proj = jnp.dot(xs, w_ref[...], preferred_element_type=jnp.float32)   # (bt*m, 3d)
    proj = proj.reshape(bt, m, 3 * d)

    q = proj[:, :, 0 * d:1 * d]   # deinterleaved (even|odd) layout, pre-scaled by 1/sqrt(d)
    k = proj[:, :, 1 * d:2 * d]   # deinterleaved (even|odd) layout
    v = proj[:, :, 2 * d:3 * d]   # original layout

    # Half-split RoPE in the permuted layout: pure f32 VPU elementwise math.
    cos = cos_ref[...][None]      # (1, m, h)
    sin = sin_ref[...][None]      # (1, m, h)

    def rope(t):
        t1 = t[:, :, :h]
        t2 = t[:, :, h:]
        return jnp.concatenate([t1 * cos + t2 * sin, t2 * cos - t1 * sin], axis=-1)

    q_rot = rope(q)
    k_rot = rope(k)

    # Causal attention.  1/sqrt(d) already folded into Wq; mask is a resident bias.
    scores = jnp.einsum('bqd,bkd->bqk',
                        q_rot.astype(jnp.bfloat16), k_rot.astype(jnp.bfloat16),
                        preferred_element_type=jnp.float32)              # (bt, m, m)
    scores = scores + bias_ref[...][None]

    # Numerically stable softmax; reciprocal goes to the (otherwise idle) EUP.
    scores = scores - jnp.max(scores, axis=-1, keepdims=True)
    p = jnp.exp(scores)
    p = p * pl.reciprocal(jnp.sum(p, axis=-1, keepdims=True), approx=True)

    out = jnp.einsum('bqk,bkd->bqd',
                     p.astype(jnp.bfloat16), v.astype(jnp.bfloat16),
                     preferred_element_type=jnp.float32)                 # (bt, m, d)
    # Lane-dense store: (bt, m*d) avoids 32-lane masked partial stores.
    o_ref[...] = out.reshape(bt, m * d).astype(o_ref.dtype)


def _tpu_core_count():
    """Best-effort TensorCore count (>1 only on megacore chips like v7x)."""
    try:
        info = pltpu.get_tpu_info()
    except Exception:
        return 1
    for attr in ("num_cores", "tensorcore_count", "num_tensorcores", "core_count"):
        n = getattr(info, attr, None)
        if isinstance(n, int) and n > 0:
            return n
    return 1


def _tpu_vmem_bytes():
    try:
        v = getattr(pltpu.get_tpu_info(), "vmem_capacity_bytes", None)
        if isinstance(v, int) and v > 0:
            return v
    except Exception:
        pass
    return 64 << 20   # conservative default (v7x physical VMEM)


def _pick_b_tile(b, m, d):
    # Size the batch tile to the VMEM budget; a single grid step whenever it fits.
    # Per-step pipeline overhead (~0.35us) dominates tiny kernels, and on the
    # single-TensorCore v5e/v6e extra "parallel" grid steps buy nothing.  Only on
    # multi-TensorCore chips (v7x megacore) keep the grid an even core multiple.
    budget = max(16 << 20, _tpu_vmem_bytes() // 4)   # stay well under scoped VMEM
    # f32 working set per batch row: x + proj(3d) + q/k/v/rot(~6d) + scores+probs(2m)
    # + out(d); x2 for double-buffered in/out blocks + headroom.
    per_row = 2 * 4 * m * (11 * d + 2 * m)
    bt = max(1, min(b, budget // max(per_row, 1)))
    ncores = _tpu_core_count()
    if ncores > 1 and b >= ncores:
        bt = min(bt, max(1, b // ncores))
    while b % bt:
        bt -= 1
    return bt


def rope_masked_attention_head(x, wq, wk, wv, R, *, b_tile=None):
    """x: (b, m, d) f32.  wq/wk/wv: (d, d) nn.Linear weights (out, in).  R: (cw, d, d)."""
    b, m, d = x.shape
    assert d % 2 == 0
    h = d // 2

    # --- Fused, pre-transposed, permuted, pre-scaled weights: (d, 3d), bf16 ----
    wq_t = jnp.asarray(wq, jnp.float32).T
    wk_t = jnp.asarray(wk, jnp.float32).T
    wv_t = jnp.asarray(wv, jnp.float32).T
    perm = np.concatenate([np.arange(0, d, 2), np.arange(1, d, 2)])   # deinterleave
    scale = 1.0 / math.sqrt(d)                                        # fold into Wq
    w_fused = jnp.concatenate(
        [wq_t[:, perm] * scale, wk_t[:, perm], wv_t], axis=1).astype(jnp.bfloat16)

    # --- Compact RoPE half-tables derived from R (faithful to the (i-1) quirk) -
    Rm = jnp.asarray(R, jnp.float32)[:m]                              # (m, d, d)
    even = np.arange(0, d, 2)
    cos_h = Rm[:, even, even]                                         # (m, h)  cos(p*theta_i)
    sin_h = Rm[:, even + 1, even]                                     # (m, h)  sin(p*theta_i)

    # --- Resident additive causal bias ----------------------------------------
    row = np.arange(m)[:, None]
    col = np.arange(m)[None, :]
    bias = jnp.asarray(np.where(col <= row, 0.0, -1e30), jnp.float32)  # (m, m)

    # --- Grid over batch tiles -------------------------------------------------
    if b_tile is None:
        b_tile = _pick_b_tile(b, m, d)
    assert b % b_tile == 0
    grid = (b // b_tile,)

    def build(single_buffer_invariants):
        extra = {}
        if single_buffer_invariants:
            # Grid-invariant inputs: no point double-buffering a block that never changes.
            extra = dict(pipeline_mode=pl.Buffered(1))

        def const2(shape):
            return pl.BlockSpec(shape, lambda i: (0, 0), **extra)

        return pl.pallas_call(
            _rope_attn_kernel,
            out_shape=jax.ShapeDtypeStruct((b, m * d), x.dtype),
            grid_spec=pltpu.PrefetchScalarGridSpec(
                num_scalar_prefetch=0,
                grid=grid,
                in_specs=[
                    pl.BlockSpec((b_tile, m, d), lambda i: (i, 0, 0)),  # x batch tile
                    const2((d, 3 * d)),                                  # fused weights
                    const2((m, h)),                                      # cos half-table
                    const2((m, h)),                                      # sin half-table
                    const2((m, m)),                                      # causal bias
                ],
                out_specs=pl.BlockSpec((b_tile, m * d), lambda i: (i, 0)),
            ),
            compiler_params=pltpu.CompilerParams(
                dimension_semantics=("parallel",),
            ),
        )

    try:
        out_flat = build(True)(x, w_fused, cos_h, sin_h, bias)
    except Exception:
        # Fallback if pipeline_mode=pl.Buffered(1) is unsupported on this jax build.
        out_flat = build(False)(x, w_fused, cos_h, sin_h, bias)

    return out_flat.reshape(b, m, d)


def _reference(x, wq, wk, wv, R):
    """Pure-JAX f32 reference of the forward pass (inference semantics, no dropout)."""
    b, m, d = x.shape
    q = x @ wq.T
    k = x @ wk.T
    v = x @ wv.T
    Rm = R[:m]
    q_rot = jnp.einsum('bmd,mde->bme', q, Rm)
    k_rot = jnp.einsum('bmd,mde->bme', k, Rm)
    scores = jnp.einsum('bqd,bkd->bqk', q_rot, k_rot) / math.sqrt(d)
    mask = jnp.tril(jnp.ones((m, m), dtype=bool))
    scores = jnp.where(mask[None], scores, jnp.finfo(jnp.float32).min)
    attn = jax.nn.softmax(scores, axis=-1)
    return jnp.einsum('bqk,bkd->bqd', attn, v)


if __name__ == "__main__":
    # config = {'d_model': 32, 'context_window': 16}; input x: (batch=2, seq=8, d_model=32)
    d_model = 32
    context_window = 16
    batch, seq = 2, 8

    key = jax.random.PRNGKey(0)
    kx, kq, kk, kv = jax.random.split(key, 4)

    x = jax.random.normal(kx, (batch, seq, d_model), dtype=jnp.float32)
    # Deterministic nn.Linear-shaped weights: (out_features, in_features).
    bound = 1.0 / math.sqrt(d_model)
    wq = jax.random.uniform(kq, (d_model, d_model), jnp.float32, -bound, bound)
    wk = jax.random.uniform(kk, (d_model, d_model), jnp.float32, -bound, bound)
    wv = jax.random.uniform(kv, (d_model, d_model), jnp.float32, -bound, bound)

    R = jnp.asarray(get_rotary_matrix(context_window, d_model))

    out = rope_masked_attention_head(x, wq, wk, wv, R)
    out = jax.block_until_ready(out)

    ref = _reference(x, wq, wk, wv, R)
    # bf16 MXU operands (+ approx softmax reciprocal) -> looser tolerance than pure f32.
    np.testing.assert_allclose(np.asarray(out), np.asarray(ref), rtol=5e-2, atol=5e-2)

    print("KERNEL_OK")
</pallas_src>

<mosaic_0001>
module attributes {stable_mosaic.version = 11 : i64} {
  func.func @_rope_attn_kernel(%arg0: i32, %arg1: memref<2x8x32xf32, #tpu.memory_space<vmem>>, %arg2: memref<32x96xbf16, #tpu.memory_space<vmem>>, %arg3: memref<8x16xf32, #tpu.memory_space<vmem>>, %arg4: memref<8x16xf32, #tpu.memory_space<vmem>>, %arg5: memref<8x8xf32, #tpu.memory_space<vmem>>, %arg6: memref<2x256xf32, #tpu.memory_space<vmem>>) attributes {dimension_semantics = [#tpu.dimension_semantics<parallel>], iteration_bounds = array<i64: 1>, scalar_prefetch = 0 : i64, scratch_operands = 0 : i64, tpu.core_type = #tpu.core_type<tc>, window_params = [{transform_indices = @transform_0, window_bounds = array<i64: 2, 8, 32>}, {pipeline_mode = #tpu.pipeline_mode<synchronous>, transform_indices = @transform_1, window_bounds = array<i64: 32, 96>}, {pipeline_mode = #tpu.pipeline_mode<synchronous>, transform_indices = @transform_2, window_bounds = array<i64: 8, 16>}, {pipeline_mode = #tpu.pipeline_mode<synchronous>, transform_indices = @transform_3, window_bounds = array<i64: 8, 16>}, {pipeline_mode = #tpu.pipeline_mode<synchronous>, transform_indices = @transform_4, window_bounds = array<i64: 8, 8>}, {transform_indices = @transform_5, window_bounds = array<i64: 2, 256>}]} {
    %c0 = arith.constant 0 : index
    %c0_0 = arith.constant 0 : index
    %c0_1 = arith.constant 0 : index
    %0 = vector.load %arg1[%c0, %c0_0, %c0_1] : memref<2x8x32xf32, #tpu.memory_space<vmem>>, vector<2x8x32xf32>
    %1 = vector.shape_cast %0 : vector<2x8x32xf32> to vector<16x32xf32>
    %2 = arith.truncf %1 : vector<16x32xf32> to vector<16x32xbf16>
    %c0_2 = arith.constant 0 : index
    %c0_3 = arith.constant 0 : index
    %3 = vector.load %arg2[%c0_2, %c0_3] : memref<32x96xbf16, #tpu.memory_space<vmem>>, vector<32x96xbf16>
    %cst = arith.constant dense<0.000000e+00> : vector<16x96xf32>
    %4 = tpu.matmul %2, %3, %cst {dimension_numbers = #tpu.dot_dimension_numbers<[1], [0], [0], [1], [0, 0, 1, 1], [], []>} : vector<16x32xbf16>, vector<32x96xbf16>, vector<16x96xf32> -> vector<16x96xf32>
    %5 = vector.shape_cast %4 : vector<16x96xf32> to vector<2x8x96xf32>
    %6 = vector.extract_strided_slice %5 {offsets = [0, 0, 0], sizes = [2, 8, 32], strides = [1, 1, 1]} : vector<2x8x96xf32> to vector<2x8x32xf32>
    %7 = vector.extract_strided_slice %5 {offsets = [0, 0, 32], sizes = [2, 8, 32], strides = [1, 1, 1]} : vector<2x8x96xf32> to vector<2x8x32xf32>
    %8 = vector.extract_strided_slice %5 {offsets = [0, 0, 64], sizes = [2, 8, 32], strides = [1, 1, 1]} : vector<2x8x96xf32> to vector<2x8x32xf32>
    %c0_4 = arith.constant 0 : index
    %c0_5 = arith.constant 0 : index
    %9 = vector.load %arg3[%c0_4, %c0_5] : memref<8x16xf32, #tpu.memory_space<vmem>>, vector<8x16xf32>
    %10 = vector.shape_cast %9 : vector<8x16xf32> to vector<1x8x16xf32>
    %c0_6 = arith.constant 0 : index
    %c0_7 = arith.constant 0 : index
    %11 = vector.load %arg4[%c0_6, %c0_7] : memref<8x16xf32, #tpu.memory_space<vmem>>, vector<8x16xf32>
    %12 = vector.shape_cast %11 : vector<8x16xf32> to vector<1x8x16xf32>
    %13 = vector.extract_strided_slice %6 {offsets = [0, 0, 0], sizes = [2, 8, 16], strides = [1, 1, 1]} : vector<2x8x32xf32> to vector<2x8x16xf32>
    %14 = vector.extract_strided_slice %6 {offsets = [0, 0, 16], sizes = [2, 8, 16], strides = [1, 1, 1]} : vector<2x8x32xf32> to vector<2x8x16xf32>
    %15 = vector.broadcast %10 : vector<1x8x16xf32> to vector<2x8x16xf32>
    %16 = arith.mulf %13, %15 : vector<2x8x16xf32>
    %17 = vector.broadcast %12 : vector<1x8x16xf32> to vector<2x8x16xf32>
    %18 = arith.mulf %14, %17 : vector<2x8x16xf32>
    %19 = arith.addf %16, %18 : vector<2x8x16xf32>
    %20 = vector.broadcast %10 : vector<1x8x16xf32> to vector<2x8x16xf32>
    %21 = arith.mulf %14, %20 : vector<2x8x16xf32>
    %22 = vector.broadcast %12 : vector<1x8x16xf32> to vector<2x8x16xf32>
    %23 = arith.mulf %13, %22 : vector<2x8x16xf32>
    %24 = arith.subf %21, %23 : vector<2x8x16xf32>
    %25 = tpu.concatenate %19, %24 in 2 : vector<2x8x16xf32>, vector<2x8x16xf32> -> vector<2x8x32xf32>
    %26 = vector.extract_strided_slice %7 {offsets = [0, 0, 0], sizes = [2, 8, 16], strides = [1, 1, 1]} : vector<2x8x32xf32> to vector<2x8x16xf32>
    %27 = vector.extract_strided_slice %7 {offsets = [0, 0, 16], sizes = [2, 8, 16], strides = [1, 1, 1]} : vector<2x8x32xf32> to vector<2x8x16xf32>
    %28 = vector.broadcast %10 : vector<1x8x16xf32> to vector<2x8x16xf32>
    %29 = arith.mulf %26, %28 : vector<2x8x16xf32>
    %30 = vector.broadcast %12 : vector<1x8x16xf32> to vector<2x8x16xf32>
    %31 = arith.mulf %27, %30 : vector<2x8x16xf32>
    %32 = arith.addf %29, %31 : vector<2x8x16xf32>
    %33 = vector.broadcast %10 : vector<1x8x16xf32> to vector<2x8x16xf32>
    %34 = arith.mulf %27, %33 : vector<2x8x16xf32>
    %35 = vector.broadcast %12 : vector<1x8x16xf32> to vector<2x8x16xf32>
    %36 = arith.mulf %26, %35 : vector<2x8x16xf32>
    %37 = arith.subf %34, %36 : vector<2x8x16xf32>
    %38 = tpu.concatenate %32, %37 in 2 : vector<2x8x16xf32>, vector<2x8x16xf32> -> vector<2x8x32xf32>
    %39 = arith.truncf %25 : vector<2x8x32xf32> to vector<2x8x32xbf16>
    %40 = arith.truncf %38 : vector<2x8x32xf32> to vector<2x8x32xbf16>
    "tpu.trace_start"() <{level = 10 : i32, message = "bqd,bkd->bqk"}> : () -> ()
    %cst_8 = arith.constant dense<0.000000e+00> : vector<2x8x8xf32>
    %41 = tpu.matmul %39, %40, %cst_8 {dimension_numbers = #tpu.dot_dimension_numbers<[2], [2], [1], [1], [0, 0, 0, 1, 1, 1], [0], [0]>} : vector<2x8x32xbf16>, vector<2x8x32xbf16>, vector<2x8x8xf32> -> vector<2x8x8xf32>
    "tpu.trace_stop"() : () -> ()
    %c0_9 = arith.constant 0 : index
    %c0_10 = arith.constant 0 : index
    %42 = vector.load %arg5[%c0_9, %c0_10] : memref<8x8xf32, #tpu.memory_space<vmem>>, vector<8x8xf32>
    %43 = vector.shape_cast %42 : vector<8x8xf32> to vector<1x8x8xf32>
    %44 = vector.broadcast %43 : vector<1x8x8xf32> to vector<2x8x8xf32>
    %45 = arith.addf %41, %44 : vector<2x8x8xf32>
    %cst_11 = arith.constant dense<0xFF800000> : vector<2x8xf32>
    %46 = vector.multi_reduction <maximumf>, %45, %cst_11 [2] : vector<2x8x8xf32> to vector<2x8xf32>
    %47 = vector.shape_cast %46 : vector<2x8xf32> to vector<2x8x1xf32>
    %48 = vector.broadcast %47 : vector<2x8x1xf32> to vector<2x8x8xf32>
    %49 = arith.subf %45, %48 : vector<2x8x8xf32>
    %50 = math.exp %49 : vector<2x8x8xf32>
    %cst_12 = arith.constant dense<0.000000e+00> : vector<2x8xf32>
    %51 = vector.multi_reduction <add>, %50, %cst_12 [2] : vector<2x8x8xf32> to vector<2x8xf32>
    %52 = vector.shape_cast %51 : vector<2x8xf32> to vector<2x8x1xf32>
    %53 = tpu.reciprocal %52 {approx = true} : vector<2x8x1xf32> -> vector<2x8x1xf32>
    %54 = vector.broadcast %53 : vector<2x8x1xf32> to vector<2x8x8xf32>
    %55 = arith.mulf %50, %54 : vector<2x8x8xf32>
    %56 = arith.truncf %55 : vector<2x8x8xf32> to vector<2x8x8xbf16>
    %57 = arith.truncf %8 : vector<2x8x32xf32> to vector<2x8x32xbf16>
    "tpu.trace_start"() <{level = 10 : i32, message = "bqk,bkd->bqd"}> : () -> ()
    %cst_13 = arith.constant dense<0.000000e+00> : vector<2x8x32xf32>
    %58 = tpu.matmul %56, %57, %cst_13 {dimension_numbers = #tpu.dot_dimension_numbers<[2], [1], [1], [2], [0, 0, 0, 1, 1, 2], [0], [0]>} : vector<2x8x8xbf16>, vector<2x8x32xbf16>, vector<2x8x32xf32> -> vector<2x8x32xf32>
    "tpu.trace_stop"() : () -> ()
    %59 = vector.shape_cast %58 : vector<2x8x32xf32> to vector<2x256xf32>
    %c0_14 = arith.constant 0 : index
    %c0_15 = arith.constant 0 : index
    %60 = vector.load %arg6[%c0_14, %c0_15] : memref<2x256xf32, #tpu.memory_space<vmem>>, vector<2x256xf32>
    tpu.vector_store %arg6[%c0_14, %c0_15], %59 {strides = array<i32>} : memref<2x256xf32, #tpu.memory_space<vmem>>, vector<2x256xf32>,
    return
  }
  func.func @transform_0(%arg0: i32) -> (i32, i32, i32) {
    %c0_i32 = arith.constant 0 : i32
    %c0_i32_0 = arith.constant 0 : i32
    %c0_i32_1 = arith.constant 0 : i32
    return %arg0, %c0_i32, %c0_i32_0 : i32, i32, i32
  }
  func.func @transform_1(%arg0: i32) -> (i32, i32) {
    %c0_i32 = arith.constant 0 : i32
    %c0_i32_0 = arith.constant 0 : i32
    %c0_i32_1 = arith.constant 0 : i32
    return %c0_i32, %c0_i32_0 : i32, i32
  }
  func.func @transform_2(%arg0: i32) -> (i32, i32) {
    %c0_i32 = arith.constant 0 : i32
    %c0_i32_0 = arith.constant 0 : i32
    %c0_i32_1 = arith.constant 0 : i32
    return %c0_i32, %c0_i32_0 : i32, i32
  }
  func.func @transform_3(%arg0: i32) -> (i32, i32) {
    %c0_i32 = arith.constant 0 : i32
    %c0_i32_0 = arith.constant 0 : i32
    %c0_i32_1 = arith.constant 0 : i32
    return %c0_i32, %c0_i32_0 : i32, i32
  }
  func.func @transform_4(%arg0: i32) -> (i32, i32) {
    %c0_i32 = arith.constant 0 : i32
    %c0_i32_0 = arith.constant 0 : i32
    %c0_i32_1 = arith.constant 0 : i32
    return %c0_i32, %c0_i32_0 : i32, i32
  }
  func.func @transform_5(%arg0: i32) -> (i32, i32) {
    %c0_i32 = arith.constant 0 : i32
    %c0_i32_0 = arith.constant 0 : i32
    return %arg0, %c0_i32 : i32, i32
  }
}

module attributes {stable_mosaic.version = 11 : i64} {
  func.func @_rope_attn_kernel(%arg0: i32, %arg1: memref<2x8x32xf32, #tpu.memory_space<vmem>>, %arg2: memref<32x96xbf16, #tpu.memory_space<vmem>>, %arg3: memref<8x16xf32, #tpu.memory_space<vmem>>, %arg4: memref<8x16xf32, #tpu.memory_space<vmem>>, %arg5: memref<8x8xf32, #tpu.memory_space<vmem>>, %arg6: memref<2x256xf32, #tpu.memory_space<vmem>>) attributes {dimension_semantics = [#tpu.dimension_semantics<parallel>], iteration_bounds = array<i64: 1>, scalar_prefetch = 0 : i64, scratch_operands = 0 : i64, tpu.core_type = #tpu.core_type<tc>, window_params = [{transform_indices = @transform_0, window_bounds = array<i64: 2, 8, 32>}, {pipeline_mode = #tpu.pipeline_mode<synchronous>, transform_indices = @transform_1, window_bounds = array<i64: 32, 96>}, {pipeline_mode = #tpu.pipeline_mode<synchronous>, transform_indices = @transform_2, window_bounds = array<i64: 8, 16>}, {pipeline_mode = #tpu.pipeline_mode<synchronous>, transform_indices = @transform_3, window_bounds = array<i64: 8, 16>}, {pipeline_mode = #tpu.pipeline_mode<synchronous>, transform_indices = @transform_4, window_bounds = array<i64: 8, 8>}, {transform_indices = @transform_5, window_bounds = array<i64: 2, 256>}]} {
    %c0 = arith.constant 0 : index
    %c0_0 = arith.constant 0 : index
    %c0_1 = arith.constant 0 : index
    %0 = vector.load %arg1[%c0, %c0_0, %c0_1] : memref<2x8x32xf32, #tpu.memory_space<vmem>>, vector<2x8x32xf32>
    %1 = vector.shape_cast %0 : vector<2x8x32xf32> to vector<16x32xf32>
    %2 = arith.truncf %1 : vector<16x32xf32> to vector<16x32xbf16>
    %c0_2 = arith.constant 0 : index
    %c0_3 = arith.constant 0 : index
    %3 = vector.load %arg2[%c0_2, %c0_3] : memref<32x96xbf16, #tpu.memory_space<vmem>>, vector<32x96xbf16>
    %cst = arith.constant dense<0.000000e+00> : vector<16x96xf32>
    %4 = tpu.matmul %2, %3, %cst {dimension_numbers = #tpu.dot_dimension_numbers<[1], [0], [0], [1], [0, 0, 1, 1], [], []>} : vector<16x32xbf16>, vector<32x96xbf16>, vector<16x96xf32> -> vector<16x96xf32>
    %5 = vector.shape_cast %4 : vector<16x96xf32> to vector<2x8x96xf32>
    %6 = vector.extract_strided_slice %5 {offsets = [0, 0, 0], sizes = [2, 8, 32], strides = [1, 1, 1]} : vector<2x8x96xf32> to vector<2x8x32xf32>
    %7 = vector.extract_strided_slice %5 {offsets = [0, 0, 32], sizes = [2, 8, 32], strides = [1, 1, 1]} : vector<2x8x96xf32> to vector<2x8x32xf32>
    %8 = vector.extract_strided_slice %5 {offsets = [0, 0, 64], sizes = [2, 8, 32], strides = [1, 1, 1]} : vector<2x8x96xf32> to vector<2x8x32xf32>
    %c0_4 = arith.constant 0 : index
    %c0_5 = arith.constant 0 : index
    %9 = vector.load %arg3[%c0_4, %c0_5] : memref<8x16xf32, #tpu.memory_space<vmem>>, vector<8x16xf32>
    %10 = vector.shape_cast %9 : vector<8x16xf32> to vector<1x8x16xf32>
    %c0_6 = arith.constant 0 : index
    %c0_7 = arith.constant 0 : index
    %11 = vector.load %arg4[%c0_6, %c0_7] : memref<8x16xf32, #tpu.memory_space<vmem>>, vector<8x16xf32>
    %12 = vector.shape_cast %11 : vector<8x16xf32> to vector<1x8x16xf32>
    %13 = vector.extract_strided_slice %6 {offsets = [0, 0, 0], sizes = [2, 8, 16], strides = [1, 1, 1]} : vector<2x8x32xf32> to vector<2x8x16xf32>
    %14 = vector.extract_strided_slice %6 {offsets = [0, 0, 16], sizes = [2, 8, 16], strides = [1, 1, 1]} : vector<2x8x32xf32> to vector<2x8x16xf32>
    %15 = vector.broadcast %10 : vector<1x8x16xf32> to vector<2x8x16xf32>
    %16 = arith.mulf %13, %15 : vector<2x8x16xf32>
    %17 = vector.broadcast %12 : vector<1x8x16xf32> to vector<2x8x16xf32>
    %18 = arith.mulf %14, %17 : vector<2x8x16xf32>
    %19 = arith.addf %16, %18 : vector<2x8x16xf32>
    %20 = vector.broadcast %10 : vector<1x8x16xf32> to vector<2x8x16xf32>
    %21 = arith.mulf %14, %20 : vector<2x8x16xf32>
    %22 = vector.broadcast %12 : vector<1x8x16xf32> to vector<2x8x16xf32>
    %23 = arith.mulf %13, %22 : vector<2x8x16xf32>
    %24 = arith.subf %21, %23 : vector<2x8x16xf32>
    %25 = tpu.concatenate %19, %24 in 2 : vector<2x8x16xf32>, vector<2x8x16xf32> -> vector<2x8x32xf32>
    %26 = vector.extract_strided_slice %7 {offsets = [0, 0, 0], sizes = [2, 8, 16], strides = [1, 1, 1]} : vector<2x8x32xf32> to vector<2x8x16xf32>
    %27 = vector.extract_strided_slice %7 {offsets = [0, 0, 16], sizes = [2, 8, 16], strides = [1, 1, 1]} : vector<2x8x32xf32> to vector<2x8x16xf32>
    %28 = vector.broadcast %10 : vector<1x8x16xf32> to vector<2x8x16xf32>
    %29 = arith.mulf %26, %28 : vector<2x8x16xf32>
    %30 = vector.broadcast %12 : vector<1x8x16xf32> to vector<2x8x16xf32>
    %31 = arith.mulf %27, %30 : vector<2x8x16xf32>
    %32 = arith.addf %29, %31 : vector<2x8x16xf32>
    %33 = vector.broadcast %10 : vector<1x8x16xf32> to vector<2x8x16xf32>
    %34 = arith.mulf %27, %33 : vector<2x8x16xf32>
    %35 = vector.broadcast %12 : vector<1x8x16xf32> to vector<2x8x16xf32>
    %36 = arith.mulf %26, %35 : vector<2x8x16xf32>
    %37 = arith.subf %34, %36 : vector<2x8x16xf32>
    %38 = tpu.concatenate %32, %37 in 2 : vector<2x8x16xf32>, vector<2x8x16xf32> -> vector<2x8x32xf32>
    %39 = arith.truncf %25 : vector<2x8x32xf32> to vector<2x8x32xbf16>
    %40 = arith.truncf %38 : vector<2x8x32xf32> to vector<2x8x32xbf16>
    "tpu.trace_start"() <{level = 10 : i32, message = "bqd,bkd->bqk"}> : () -> ()
    %cst_8 = arith.constant dense<0.000000e+00> : vector<2x8x8xf32>
    %41 = tpu.matmul %39, %40, %cst_8 {dimension_numbers = #tpu.dot_dimension_numbers<[2], [2], [1], [1], [0, 0, 0, 1, 1, 1], [0], [0]>} : vector<2x8x32xbf16>, vector<2x8x32xbf16>, vector<2x8x8xf32> -> vector<2x8x8xf32>
    "tpu.trace_stop"() : () -> ()
    %c0_9 = arith.constant 0 : index
    %c0_10 = arith.constant 0 : index
    %42 = vector.load %arg5[%c0_9, %c0_10] : memref<8x8xf32, #tpu.memory_space<vmem>>, vector<8x8xf32>
    %43 = vector.shape_cast %42 : vector<8x8xf32> to vector<1x8x8xf32>
    %44 = vector.broadcast %43 : vector<1x8x8xf32> to vector<2x8x8xf32>
    %45 = arith.addf %41, %44 : vector<2x8x8xf32>
    %cst_11 = arith.constant dense<0xFF800000> : vector<2x8xf32>
    %46 = vector.multi_reduction <maximumf>, %45, %cst_11 [2] : vector<2x8x8xf32> to vector<2x8xf32>
    %47 = vector.shape_cast %46 : vector<2x8xf32> to vector<2x8x1xf32>
    %48 = vector.broadcast %47 : vector<2x8x1xf32> to vector<2x8x8xf32>
    %49 = arith.subf %45, %48 : vector<2x8x8xf32>
    %50 = math.exp %49 : vector<2x8x8xf32>
    %cst_12 = arith.constant dense<0.000000e+00> : vector<2x8xf32>
    %51 = vector.multi_reduction <add>, %50, %cst_12 [2] : vector<2x8x8xf32> to vector<2x8xf32>
    %52 = vector.shape_cast %51 : vector<2x8xf32> to vector<2x8x1xf32>
    %53 = tpu.reciprocal %52 {approx = true} : vector<2x8x1xf32> -> vector<2x8x1xf32>
    %54 = vector.broadcast %53 : vector<2x8x1xf32> to vector<2x8x8xf32>
    %55 = arith.mulf %50, %54 : vector<2x8x8xf32>
    %56 = arith.truncf %55 : vector<2x8x8xf32> to vector<2x8x8xbf16>
    %57 = arith.truncf %8 : vector<2x8x32xf32> to vector<2x8x32xbf16>
    "tpu.trace_start"() <{level = 10 : i32, message = "bqk,bkd->bqd"}> : () -> ()
    %cst_13 = arith.constant dense<0.000000e+00> : vector<2x8x32xf32>
    %58 = tpu.matmul %56, %57, %cst_13 {dimension_numbers = #tpu.dot_dimension_numbers<[2], [1], [1], [2], [0, 0, 0, 1, 1, 2], [0], [0]>} : vector<2x8x8xbf16>, vector<2x8x32xbf16>, vector<2x8x32xf32> -> vector<2x8x32xf32>
    "tpu.trace_stop"() : () -> ()
    %59 = vector.shape_cast %58 : vector<2x8x32xf32> to vector<2x256xf32>
    %c0_14 = arith.constant 0 : index
    %c0_15 = arith.constant 0 : index
    %60 = vector.load %arg6[%c0_14, %c0_15] : memref<2x256xf32, #tpu.memory_space<vmem>>, vector<2x256xf32>
    tpu.vector_store %arg6[%c0_14, %c0_15], %59 {strides = array<i32>} : memref<2x256xf32, #tpu.memory_space<vmem>>, vector<2x256xf32>,
    return
  }
  func.func @transform_0(%arg0: i32) -> (i32, i32, i32) {
    %c0_i32 = arith.constant 0 : i32
    %c0_i32_0 = arith.constant 0 : i32
    %c0_i32_1 = arith.constant 0 : i32
    return %arg0, %c0_i32, %c0_i32_0 : i32, i32, i32
  }
  func.func @transform_1(%arg0: i32) -> (i32, i32) {
    %c0_i32 = arith.constant 0 : i32
    %c0_i32_0 = arith.constant 0 : i32
    %c0_i32_1 = arith.constant 0 : i32
    return %c0_i32, %c0_i32_0 : i32, i32
  }
  func.func @transform_2(%arg0: i32) -> (i32, i32) {
    %c0_i32 = arith.constant 0 : i32
    %c0_i32_0 = arith.constant 0 : i32
    %c0_i32_1 = arith.constant 0 : i32
    return %c0_i32, %c0_i32_0 : i32, i32
  }
  func.func @transform_3(%arg0: i32) -> (i32, i32) {
    %c0_i32 = arith.constant 0 : i32
    %c0_i32_0 = arith.constant 0 : i32
    %c0_i32_1 = arith.constant 0 : i32
    return %c0_i32, %c0_i32_0 : i32, i32
  }
  func.func @transform_4(%arg0: i32) -> (i32, i32) {
    %c0_i32 = arith.constant 0 : i32
    %c0_i32_0 = arith.constant 0 : i32
    %c0_i32_1 = arith.constant 0 : i32
    return %c0_i32, %c0_i32_0 : i32, i32
  }
  func.func @transform_5(%arg0: i32) -> (i32, i32) {
    %c0_i32 = arith.constant 0 : i32
    %c0_i32_0 = arith.constant 0 : i32
    return %arg0, %c0_i32 : i32, i32
  }
}

</mosaic_0001>

<bundles_post_ra>
// kernel: tpu_custom_call.1
= control target key start
LH: loop header
LB: loop body
LE: loop exit
PB: predicated region body
PF: predicated region fallthrough
CT: control target
= control target key end

     0   :  { %10 = vsyncpa [#allocation3], 0  ;;  %s805_s0 = inlined_call_operand.hbm [shape: f32[2,8,32], index: 0, kind: input, shape index: {}]   ;;  %s806_s1 = inlined_call_operand.hbm [shape: bf16[32,96], index: 1, kind: input, shape index: {}]   ;;  %s807_s2 = inlined_call_operand.hbm [shape: f32[8,16], index: 2, kind: input, shape index: {}]   ;;  %s808_s3 = inlined_call_operand.hbm [shape: f32[8,16], index: 3, kind: input, shape index: {}]   ;;  %s809_s4 = inlined_call_operand.hbm [shape: f32[8,8], index: 4, kind: input, shape index: {}]   ;;  %s810_s5 = inlined_call_operand.hbm [shape: f32[2,256], index: 5, kind: output, shape index: {}]  }
   0x1   :  { %11 = vsyncpa [#allocation6], 0 }
   0x2   :  { %12 = vsyncpa [#allocation9], 0  ;;  %s31_s20 = sshll.u32 %s806_s1, 4  ;;  %s32_s20 = int_to_ptr.hbm [resolvable:$true] %s31_s20 }
   0x3   :  { %13 = vsyncpa [#allocation4], 0  ;;  %s662_s21 = smov [#allocation5]   ;;  %s56_s25 = sshll.u32 %s808_s3, 4  ;;  %s57_s25 = int_to_ptr.hbm [resolvable:$true] %s56_s25 }
   0x4   :  { %s33_s22 = sshll.u32 %s662_s21, 4  ;;  %s663_s26 = smov 64   ;;  %s34_s22 = int_to_ptr.vmem [resolvable:$true] %s33_s22 }
   0x5   :  { %s664_s27 = smov 4   ;;  %s665_s28 = smov [#allocation8]  }
   0x6   :  { %39 = dma.hbm_to_vmem [thread:$0]  %s32_s20, 256, %s34_s22, [#allocation6], %s663_s26, %s663_s26, %s664_s27  }
   0x7   :  { %s58_s29 = sshll.u32 %s665_s28, 4  ;;  %s18_s1 = sshll.u32 %s805_s0, 4  ;;  %s59_s29 = int_to_ptr.vmem [resolvable:$true] %s58_s29  ;;  %s19_s1 = int_to_ptr.hbm [resolvable:$true] %s18_s1 }
   0x8   :  { %61 = dma.hbm_to_vmem [thread:$0]  %s57_s25, 128, %s59_s29, [#allocation9]  }
   0x9   :  { %s666_s7 = smov [#allocation2]   ;;  %s45_s10 = sshll.u32 %s807_s2, 4  ;;  %s46_s10 = int_to_ptr.hbm [resolvable:$true] %s45_s10 }
   0xa   :  { %s20_s8 = sshll.u32 %s666_s7, 4  ;;  %s667_s11 = smov 128   ;;  %s21_s8 = int_to_ptr.vmem [resolvable:$true] %s20_s8 }
   0xb   :  { %s668_s12 = smov 8   ;;  %s669_s13 = smov [#allocation7]  }
   0xc   :  { %26 = dma.hbm_to_vmem [thread:$0]  %s19_s1, 256, %s21_s8, [#allocation3], %s667_s11, %s667_s11, %s668_s12  }
   0xd   :  { %s47_s14 = sshll.u32 %s669_s13, 4  ;;  %s67_s0 = sshll.u32 %s809_s4, 4  ;;  %s48_s14 = int_to_ptr.vmem [resolvable:$true] %s47_s14  ;;  %s68_s0 = int_to_ptr.hbm [resolvable:$true] %s67_s0 }
   0xe   :  { %50 = dma.hbm_to_vmem [thread:$0]  %s46_s10, 128, %s48_s14, [#allocation6]  }
   0xf   :  { %s670_s17 = smov [#allocation10]  }
  0x10   :  { %s69_s18 = sshll.u32 %s670_s17, 4  ;;  %s70_s18 = int_to_ptr.vmem [resolvable:$true] %s69_s18 }
  0x11   :  { %72 = dma.hbm_to_vmem [thread:$0]  %s68_s0, 128, %s70_s18, [#allocation9]  }
  0x12   :  { %654 = dma.done.wait [#allocation3], 256  }
  0x13   :  { %655 = vsyncadd [#allocation3], 4294967040 }
  0x14   :  { %656 = dma.done.wait [#allocation6], 384  }
  0x15   :  { %657 = vsyncadd [#allocation6], 4294966912 }
  0x16   :  { %658 = dma.done.wait [#allocation9], 256  }
  0x17   :  { %659 = vsyncadd [#allocation9], 4294967040  ;;  %v474_v0 = vld [vmem:[#allocation5 + $0x8] sm:$0xff]  ;;  %v132_v1 = vld [vmem:[#allocation8] sm:$0xff]  ;;  %s671_s2 = smov 48   ;;  %s672_s4 = smov 32  }
  0x18   :  { %177 = vrot.lane.b32.xlu0 %v132_v1, %s671_s2  ;;  %v726_v2 = vld [vmem:[#allocation7] sm:$0xff]  ;;  %123 = vmatpush.bf16.msra.mxu0 %v474_v0  ;;  %v473_v3 = vld [vmem:[#allocation5] sm:$0xff]  ;;  %v95_v5 = vld [vmem:[#allocation2 + $0x8] sm:$0xff]  ;;  %vm113_vm0 = vcmask 261120   ;;  %s673_s19 = smov 16   ;;  %s674_s20 = smov 112  }
  0x19   :  { %v94_v4 = vld [vmem:[#allocation2] sm:$0xff]  ;;  %172 = vrot.lane.b32.xlu1 %v726_v2, %s672_s4  ;;  %s675_s21 = smov 96   ;;  %vm169_vm1 = vcmask 130048   ;;  %vm273_vm2 = vcmask 64512   ;;  %vm308_vm3 = vcmask 1043456   ;;  %vm350_vm4 = vcmask 1047556  }
  0x1a   :  { %v96_v6 = vpack.c.bf16 %v95_v5, %v94_v4  ;;  %vm427_vm5 = vcmask 523264   ;;  %vm429_vm6 = vcmask 785408   ;;  %s678_s22 = smov [#allocation11]   ;;  %s448_s27 = sshll.u32 %s810_s5, 4  ;;  %vm437_vm7 = vcmask 1041408   ;;  %s449_s27 = int_to_ptr.hbm [resolvable:$true] %s448_s27 }
  0x1b   :  { %s446_s23 = sshll.u32 %s678_s22, 4  ;;  %s447_s23 = int_to_ptr.vmem [resolvable:$true] %s446_s23 }
  0x1c   :  { %124 = vmatpush.bf16.msra.mxu0 %v473_v3 }
  0x1f   :  { %468 = vmatmul.msk.bf16.vlgmr.msra.gmra.mxu0 %vm113_vm0, %v96_v6 }
  0x20   :  { %197 = vrot.lane.b32.xlu0 %v132_v1, %s672_s4 }
  0x21   :  { %192 = vrot.lane.b32.xlu1 %v726_v2, %s671_s2 }
  0x28   :  { %136 = vrot.lane.b32.xlu0 %v132_v1, %s673_s19 }
  0x8a   :  { %v178_v7 = vpop.permute.xlu0 %177 }
  0x8b   :  { %v173_v18 = vpop.permute.xlu1 %172 }
  0x92   :  { %v198_v10 = vpop.permute.xlu0 %197 }
  0x93   :  { %v193_v20 = vpop.permute.xlu1 %192 }
  0x9a   :  { %v137_v15 = vpop.permute.xlu0 %136 }
  0x9c   :  { %v734_v8 = vpop.f32.mrf.mxu0 }
  0x9d   :  { %v180_v9 = vmul.f32 %v178_v7, %v734_v8  ;;  %v200_v12 = vmul.f32 %v198_v10, %v734_v8  ;;  %v139_v16 = vmul.f32 %v137_v15, %v734_v8  ;;  %v175_v21 = vmul.f32 %v173_v18, %v734_v8 }
  0x9e   :  { %v195_v22 = vmul.f32 %v193_v20, %v734_v8  ;;  %v157_v27 = vmul.f32 %v132_v1, %v734_v8  ;;  %v133_v44 = vmul.f32 %v726_v2, %v734_v8 }
  0x9f   :  { %184 = vrot.lane.b32.xlu2 %v180_v9, %s674_s20 }
  0xa4   :  { %v737_v11 = vpop.f32.mrf.mxu0 }
  0xa5   :  { %v181_v13 = vmul.f32 %v178_v7, %v737_v11  ;;  %v201_v14 = vmul.f32 %v198_v10, %v737_v11  ;;  %v140_v17 = vmul.f32 %v137_v15, %v737_v11  ;;  %v158_v28 = vmul.f32 %v132_v1, %v737_v11  ;;  %v234_v1 = vld [vmem:[#allocation10] sm:$0xff] }
  0xa6   :  { %v196_v30 = vmul.f32 %v193_v20, %v737_v11  ;;  %v176_v31 = vmul.f32 %v173_v18, %v737_v11  ;;  %v134_v59 = vmul.f32 %v726_v2, %v737_v11  ;;  %v299_v20 = vpack.c.bf16 %v737_v11, %v737_v11 }
  0xa7   :  { %204 = vrot.lane.b32.xlu2 %v200_v12, %s673_s19  ;;  %186 = vrot.lane.b32.xlu1 %v181_v13, %s674_s20  ;;  %v298_v12 = vpack.c.bf16 %v734_v8, %v734_v8 }
  0xa9   :  { %v301_v13 = vunpack.c.l.b16 %v298_v12 }
  0xaf   :  { %206 = vrot.lane.b32.xlu2 %v201_v14, %s673_s19  ;;  %152 = vrot.lane.b32.xlu1 %v726_v2, %s673_s19  ;;  %v302_v14 = vpack.c.b16 %v301_v13, %v301_v13 }
  0xb7   :  { %143 = vrot.lane.b32.xlu2 %v139_v16, %s674_s20 }
  0xbf   :  { %145 = vrot.lane.b32.xlu2 %v140_v17, %s674_s20 }
  0xf9   :  { %v185_v19 = vpop.permute.xlu2 %184 }
  0xfa   :  { %v190_v24 = vadd.f32 %v185_v19, %v175_v21  ;;  %v326_v21 = vunpack.c.l.b16 %v299_v20 }
 0x101   :  { %v205_v23 = vpop.permute.xlu2 %204 }
 0x102   :  { %v210_v25 = vsub.f32 %v195_v22, %v205_v23 }
 0x104   :  { %v492_v26 = vpack.i.bf16 %v210_v25, %v190_v24  ;;  %v327_v24 = vpack.c.b16 %v326_v21, %v326_v21 }
 0x106   :  { %493 = vrot.lane.b32.xlu0 %v492_v26, %s675_s21 }
 0x109   :  { %v207_v29 = vpop.permute.xlu2 %206 }
 0x10a   :  { %v211_v33 = vsub.f32 %v196_v30, %v207_v29 }
 0x10e   :  { %161 = vrot.lane.b32.xlu0 %v157_v27, %s673_s19 }
 0x111   :  { %v144_v42 = vpop.permute.xlu2 %143 }
 0x112   :  { %v149_v47 = vadd.f32 %v144_v42, %v133_v44 }
 0x116   :  { %163 = vrot.lane.b32.xlu0 %v158_v28, %s673_s19 }
 0x119   :  { %v187_v32 = vpop.permute.xlu1 %186  ;;  %v146_v57 = vpop.permute.xlu2 %145 }
 0x11a   :  { %v191_v34 = vadd.f32 %v187_v32, %v176_v31  ;;  %v150_v62 = vadd.f32 %v146_v57, %v134_v59 }
 0x11c   :  { %v497_v35 = vpack.i.bf16 %v211_v33, %v191_v34 }
 0x11e   :  { %498 = vrot.lane.b32.xlu1 %v497_v35, %s675_s21 }
 0x121   :  { %v153_v40 = vpop.permute.xlu1 %152 }
 0x122   :  { %v155_v45 = vmul.f32 %v153_v40, %v734_v8  ;;  %v156_v55 = vmul.f32 %v153_v40, %v737_v11 }
 0x178   :  { %v494_v36 = vpop.permute.xlu0 %493 }
 0x179   :  { %v496_v37 = vunpack.i.h.bf16 %v494_v36  ;;  %v495_v38 = vunpack.i.l.bf16 %v494_v36 }
 0x17b   :  { %v228_v39 = vsel %vm169_vm1, %v495_v38, %v496_v37 }
 0x17c   :  { %v232_v41 = vpack.c.bf16 %v228_v39, %v228_v39 }
 0x17e   :  { %v239_v43 = vsel %vm113_vm0, %v232_v41, 0  ;;  %v676_v41 = vmov 1983009808  }
 0x17f   :  { %248 = vmatpush.bf16.xpose.msra.mxu1 %v239_v43  ;;  %v353_v42 = vunpack.c.l.s4 %v676_v41 }
 0x180   :  { %v162_v46 = vpop.permute.xlu0 %161 }
 0x181   :  { %v167_v48 = vsub.f32 %v155_v45, %v162_v46  ;;  %v354_v44 = vunpack.c.0.s8 %v353_v42 }
 0x183   :  { %v170_v49 = vsel %vm169_vm1, %v149_v47, %v167_v48  ;;  %v677_v47 = vmov 1934713408  }
 0x184   :  { %v230_v50 = vpack.c.bf16 %v170_v49, %v170_v49  ;;  %v375_v48 = vunpack.c.l.s4 %v677_v47 }
 0x186   :  { %469 = vmatmul.msk.bf16.vlgmr.msra.gmra.mxu1 %vm113_vm0, %v230_v50 }
 0x188   :  { %v164_v54 = vpop.permute.xlu0 %163 }
 0x189   :  { %v168_v60 = vsub.f32 %v156_v55, %v164_v54 }
 0x18b   :  { %v171_v63 = vsel %vm169_vm1, %v150_v62, %v168_v60 }
 0x18c   :  { %v231_v0 = vpack.c.bf16 %v171_v63, %v171_v63 }
 0x190   :  { %v499_v51 = vpop.permute.xlu1 %498 }
 0x191   :  { %v501_v52 = vunpack.i.h.bf16 %v499_v51  ;;  %v500_v53 = vunpack.i.l.bf16 %v499_v51 }
 0x193   :  { %v229_v56 = vsel %vm169_vm1, %v500_v53, %v501_v52 }
 0x194   :  { %v233_v58 = vpack.c.bf16 %v229_v56, %v229_v56  ;;  %v376_v56 = vunpack.c.0.s8 %v375_v48 }
 0x196   :  { %v258_v61 = vsel %vm113_vm0, %v233_v58, 0 }
 0x197   :  { %267 = vmatpush.bf16.xpose.msra.mxu2 %v258_v61 }
 0x19e   :  { %470 = vmatmul.msk.bf16.vlgmr.msra.gmra.mxu2 %vm113_vm0, %v231_v0 }
 0x203   :  { %v250_v3 = vpop.f32.mrf.mxu1 }
 0x204   :  { %v251_v4 = vadd.f32 %v250_v3, %v234_v1 }
 0x206   :  { %v274_v5 = vsel %vm273_vm2, %v251_v4, -inf }
 0x207   :  { %275 = vmax.xlane.f32.xlu1 %v274_v5 }
 0x20b   :  { %v252_v6 = vpop.f32.mrf.mxu1 }
 0x221   :  { %v269_v7 = vpop.f32.mrf.mxu2 }
 0x222   :  { %v270_v2 = vadd.f32 %v269_v7, %v234_v1 }
 0x224   :  { %v277_v9 = vsel %vm273_vm2, %v270_v2, -inf }
 0x225   :  { %278 = vmax.xlane.f32.xlu2 %v277_v9 }
 0x229   :  { %v271_v10 = vpop.f32.mrf.mxu2 }
 0x23d   :  { %303 = vrot.lane.b32.xlu2 %v302_v14, %s663_s26 }
 0x27a   :  { %v276_v15 = vpop.xlane.xlu1 %275 }
 0x27b   :  { %v280_v16 = vsub.f32 %v251_v4, %v276_v15 }
 0x27d   :  { %v282_v17 = vmul.f32 1.442695, %v280_v16 }
 0x27f   :  { %502 = vpow2.f32 %v282_v17 }
 0x285   :  { %v503_v18 = vpop.eup %502 }
 0x286   :  { %v286_v19 = vsel %vm273_vm2, %v503_v18, 0.0 }
 0x287   :  { %287 = vadd.xlane.f32.xlu0 %v286_v19 }
 0x298   :  { %v279_v22 = vpop.xlane.xlu2 %278 }
 0x299   :  { %v281_v23 = vsub.f32 %v270_v2, %v279_v22 }
 0x29b   :  { %v284_v8 = vmul.f32 1.442695, %v281_v23  ;;  %328 = vrot.lane.b32.xlu0 %v327_v24, %s663_s26 }
 0x29d   :  { %504 = vpow2.f32 %v284_v8 }
 0x2a0   :  { %v304_v25 = vpop.permute.xlu2 %303 }
 0x2a1   :  { %v310_v26 = vsel %vm308_vm3, %v304_v25, 0 }
 0x2a2   :  { %319 = vmatpush.bf16.msra.mxu3 %v310_v26 }
 0x2a3   :  { %v505_v27 = vpop.eup %504 }
 0x2a4   :  { %v289_v28 = vsel %vm273_vm2, %v505_v27, 0.0 }
 0x2a5   :  { %290 = vadd.xlane.f32.xlu1 %v289_v28 }
 0x2fa   :  { %v288_v29 = vpop.xlane.xlu0 %287 }
 0x2fb   :  { %506 = vrcp.f32 %v288_v29 }
 0x301   :  { %v507_v30 = vpop.eup %506 }
 0x302   :  { %v294_v11 = vmul.f32 %v507_v30, %v503_v18 }
 0x304   :  { %v296_v31 = vpack.c.bf16 %v294_v11, %v294_v11 }
 0x306   :  { %471 = vmatmul.msk.bf16.vlgmr.msra.gmra.mxu3 %vm273_vm2, %v296_v31 }
 0x30d   :  { %v329_v32 = vpop.permute.xlu0 %328 }
 0x30e   :  { %v334_v33 = vsel %vm308_vm3, %v329_v32, 0 }
 0x30f   :  { %343 = vmatpush.bf16.msrb.mxu3 %v334_v33 }
 0x318   :  { %v291_v34 = vpop.xlane.xlu1 %290 }
 0x319   :  { %508 = vrcp.f32 %v291_v34 }
 0x31f   :  { %v509_v35 = vpop.eup %508 }
 0x320   :  { %v295_v36 = vmul.f32 %v509_v35, %v505_v27 }
 0x322   :  { %v297_v37 = vpack.c.bf16 %v295_v36, %v295_v36 }
 0x324   :  { %472 = vmatmul.msk.bf16.vlgmr.msrb.gmra.mxu3 %vm273_vm2, %v297_v37 }
 0x389   :  { %v321_v38 = vpop.f32.mrf.mxu3 }
 0x38a   :  { %v349_v40 = vrot.slane %v321_v38, 4  ;;  %v355_v49 = vperm.slane %v321_v38, %v354_v44 }
 0x38c   :  { %v351_v43 = vsel %vm350_vm4, 0.0, %v349_v40  ;;  %v372_v57 = vrot.slane %v355_v49, 4 }
 0x38d   :  { %v359_v45 = vperm.slane %v351_v43, %v354_v44 }
 0x38f   :  { %v384_v54 = vrot.slane %v359_v45, 4 }
 0x391   :  { %v323_v39 = vpop.f32.mrf.mxu3 }
 0x3a7   :  { %v345_v46 = vpop.f32.mrf.mxu3 }
 0x3a8   :  { %v360_v50 = vrot.slane %v345_v46, 4  ;;  %v365_v51 = vperm.slane %v345_v46, %v354_v44 }
 0x3aa   :  { %v361_v52 = vsel %vm350_vm4, 0.0, %v360_v50  ;;  %v370_v53 = vrot.slane %v365_v51, 4  ;;  %v373_v62 = vsel %vm350_vm4, %v365_v51, %v372_v57 }
 0x3ab   :  { %v369_v55 = vperm.slane %v361_v52, %v354_v44  ;;  %v381_v6 = vperm.slane %v373_v62, %v376_v56 }
 0x3ac   :  { %v371_v58 = vsel %vm350_vm4, %v370_v53, %v355_v49 }
 0x3ad   :  { %v382_v59 = vrot.slane %v369_v55, 4  ;;  %v385_v60 = vsel %vm350_vm4, %v369_v55, %v384_v54  ;;  %v377_v61 = vperm.slane %v371_v58, %v376_v56  ;;  %v396_v10 = vrot.slane %v381_v6, 4 }
 0x3ae   :  { %v393_v63 = vperm.slane %v385_v60, %v376_v56 }
 0x3af   :  { %v347_v0 = vpop.f32.mrf.mxu3  ;;  %v394_v1 = vrot.slane %v377_v61, 4  ;;  %v383_v3 = vsel %vm350_vm4, %v382_v59, %v359_v45  ;;  %v397_v13 = vsel %vm350_vm4, 0.0, %v396_v10 }
 0x3b0   :  { %419 = vrot.lane.b32.xlu2 %v393_v63, %s663_s26  ;;  %v389_v4 = vperm.slane %v383_v3, %v376_v56  ;;  %v400_v2 = vrot.slane %v393_v63, 4 }
 0x3b1   :  { %v395_v5 = vsel %vm350_vm4, 0.0, %v394_v1 }
 0x3b2   :  { %403 = vrot.lane.b32.xlu0 %v395_v5, %s672_s4  ;;  %v398_v7 = vrot.slane %v389_v4, 4  ;;  %v401_v12 = vsel %vm350_vm4, 0.0, %v400_v2 }
 0x3b4   :  { %v399_v9 = vsel %vm350_vm4, 0.0, %v398_v7 }
 0x3b5   :  { %415 = vrot.lane.b32.xlu1 %v399_v9, %s672_s4 }
 0x3b8   :  { %423 = vrot.lane.b32.xlu2 %v401_v12, %s675_s21 }
 0x3ba   :  { %411 = vrot.lane.b32.xlu0 %v397_v13, %s675_s21 }
 0x3bd   :  { %407 = vrot.lane.b32.xlu1 %v381_v6, %s663_s26 }
 0x40a   :  { %v420_v14 = vpop.permute.xlu2 %419 }
 0x412   :  { %v424_v19 = vpop.permute.xlu2 %423 }
 0x424   :  { %v404_v15 = vpop.permute.xlu0 %403 }
 0x425   :  { %v426_v21 = vsel %vm113_vm0, %v377_v61, %v404_v15 }
 0x427   :  { %v416_v16 = vpop.permute.xlu1 %415 }
 0x428   :  { %v431_v17 = vsel %vm113_vm0, %v389_v4, %v416_v16 }
 0x429   :  { %v432_v18 = vsel %vm427_vm5, %v431_v17, %v420_v14 }
 0x42a   :  { %v433_v20 = vsel %vm429_vm6, %v432_v18, %v424_v19 }
 0x42b   :  { %v436_v23 = vrot.slane %v433_v20, 6 }
 0x42c   :  { %v412_v24 = vpop.permute.xlu0 %411 }
 0x42f   :  { %v408_v22 = vpop.permute.xlu1 %407 }
 0x430   :  { %v428_v8 = vsel %vm427_vm5, %v426_v21, %v408_v22 }
 0x431   :  { %v430_v25 = vsel %vm429_vm6, %v428_v8, %v412_v24 }
 0x432   :  { %v438_v26 = vsel %vm437_vm7, %v430_v25, %v436_v23 }
 0x433   :  { %440 = vst [vmem:[#allocation11] sm:$0xf] %v438_v26 }
 0x434   :  { %451 = dma.vmem_to_hbm [thread:$0]  %s447_s23, 64, %s449_s27, [#allocation4]  }
 0x435   :  { %660 = dma.done.wait [#allocation4], 64  }
 0x436   :  { %661 = vsyncadd [#allocation4], 4294967232 }
 0x437   :  { %456 = vsyncpa [#allocation3], 1 }
 0x438   :  { %457 = vsyncpa [#allocation6], 1 }
 0x439   :  { %458 = vsyncpa [#allocation9], 1 }
 0x43a   :  { %459 = vsyncpa [#allocation4], 1 }

// kernel: tpu_custom_call.1
= control target key start
LH: loop header
LB: loop body
LE: loop exit
PB: predicated region body
PF: predicated region fallthrough
CT: control target
= control target key end

     0   :  { %10 = vsyncpa [#allocation3], 0  ;;  %s805_s0 = inlined_call_operand.hbm [shape: f32[2,8,32], index: 0, kind: input, shape index: {}]   ;;  %s806_s1 = inlined_call_operand.hbm [shape: bf16[32,96], index: 1, kind: input, shape index: {}]   ;;  %s807_s2 = inlined_call_operand.hbm [shape: f32[8,16], index: 2, kind: input, shape index: {}]   ;;  %s808_s3 = inlined_call_operand.hbm [shape: f32[8,16], index: 3, kind: input, shape index: {}]   ;;  %s809_s4 = inlined_call_operand.hbm [shape: f32[8,8], index: 4, kind: input, shape index: {}]   ;;  %s810_s5 = inlined_call_operand.hbm [shape: f32[2,256], index: 5, kind: output, shape index: {}]  }
   0x1   :  { %11 = vsyncpa [#allocation6], 0 }
   0x2   :  { %12 = vsyncpa [#allocation9], 0  ;;  %s31_s20 = sshll.u32 %s806_s1, 4  ;;  %s32_s20 = int_to_ptr.hbm [resolvable:$true] %s31_s20 }
   0x3   :  { %13 = vsyncpa [#allocation4], 0  ;;  %s662_s21 = smov [#allocation5]   ;;  %s56_s25 = sshll.u32 %s808_s3, 4  ;;  %s57_s25 = int_to_ptr.hbm [resolvable:$true] %s56_s25 }
   0x4   :  { %s33_s22 = sshll.u32 %s662_s21, 4  ;;  %s663_s26 = smov 64   ;;  %s34_s22 = int_to_ptr.vmem [resolvable:$true] %s33_s22 }
   0x5   :  { %s664_s27 = smov 4   ;;  %s665_s28 = smov [#allocation8]  }
   0x6   :  { %39 = dma.hbm_to_vmem [thread:$0]  %s32_s20, 256, %s34_s22, [#allocation6], %s663_s26, %s663_s26, %s664_s27  }
   0x7   :  { %s58_s29 = sshll.u32 %s665_s28, 4  ;;  %s18_s1 = sshll.u32 %s805_s0, 4  ;;  %s59_s29 = int_to_ptr.vmem [resolvable:$true] %s58_s29  ;;  %s19_s1 = int_to_ptr.hbm [resolvable:$true] %s18_s1 }
   0x8   :  { %61 = dma.hbm_to_vmem [thread:$0]  %s57_s25, 128, %s59_s29, [#allocation9]  }
   0x9   :  { %s666_s7 = smov [#allocation2]   ;;  %s45_s10 = sshll.u32 %s807_s2, 4  ;;  %s46_s10 = int_to_ptr.hbm [resolvable:$true] %s45_s10 }
   0xa   :  { %s20_s8 = sshll.u32 %s666_s7, 4  ;;  %s667_s11 = smov 128   ;;  %s21_s8 = int_to_ptr.vmem [resolvable:$true] %s20_s8 }
   0xb   :  { %s668_s12 = smov 8   ;;  %s669_s13 = smov [#allocation7]  }
   0xc   :  { %26 = dma.hbm_to_vmem [thread:$0]  %s19_s1, 256, %s21_s8, [#allocation3], %s667_s11, %s667_s11, %s668_s12  }
   0xd   :  { %s47_s14 = sshll.u32 %s669_s13, 4  ;;  %s67_s0 = sshll.u32 %s809_s4, 4  ;;  %s48_s14 = int_to_ptr.vmem [resolvable:$true] %s47_s14  ;;  %s68_s0 = int_to_ptr.hbm [resolvable:$true] %s67_s0 }
   0xe   :  { %50 = dma.hbm_to_vmem [thread:$0]  %s46_s10, 128, %s48_s14, [#allocation6]  }
   0xf   :  { %s670_s17 = smov [#allocation10]  }
  0x10   :  { %s69_s18 = sshll.u32 %s670_s17, 4  ;;  %s70_s18 = int_to_ptr.vmem [resolvable:$true] %s69_s18 }
  0x11   :  { %72 = dma.hbm_to_vmem [thread:$0]  %s68_s0, 128, %s70_s18, [#allocation9]  }
  0x12   :  { %654 = dma.done.wait [#allocation3], 256  }
  0x13   :  { %655 = vsyncadd [#allocation3], 4294967040 }
  0x14   :  { %656 = dma.done.wait [#allocation6], 384  }
  0x15   :  { %657 = vsyncadd [#allocation6], 4294966912 }
  0x16   :  { %658 = dma.done.wait [#allocation9], 256  }
  0x17   :  { %659 = vsyncadd [#allocation9], 4294967040  ;;  %v474_v0 = vld [vmem:[#allocation5 + $0x8] sm:$0xff]  ;;  %v132_v1 = vld [vmem:[#allocation8] sm:$0xff]  ;;  %s671_s2 = smov 48   ;;  %s672_s4 = smov 32  }
  0x18   :  { %177 = vrot.lane.b32.xlu0 %v132_v1, %s671_s2  ;;  %v726_v2 = vld [vmem:[#allocation7] sm:$0xff]  ;;  %123 = vmatpush.bf16.msra.mxu0 %v474_v0  ;;  %v473_v3 = vld [vmem:[#allocation5] sm:$0xff]  ;;  %v95_v5 = vld [vmem:[#allocation2 + $0x8] sm:$0xff]  ;;  %vm113_vm0 = vcmask 261120   ;;  %s673_s19 = smov 16   ;;  %s674_s20 = smov 112  }
  0x19   :  { %v94_v4 = vld [vmem:[#allocation2] sm:$0xff]  ;;  %172 = vrot.lane.b32.xlu1 %v726_v2, %s672_s4  ;;  %s675_s21 = smov 96   ;;  %vm169_vm1 = vcmask 130048   ;;  %vm273_vm2 = vcmask 64512   ;;  %vm308_vm3 = vcmask 1043456   ;;  %vm350_vm4 = vcmask 1047556  }
  0x1a   :  { %v96_v6 = vpack.c.bf16 %v95_v5, %v94_v4  ;;  %vm427_vm5 = vcmask 523264   ;;  %vm429_vm6 = vcmask 785408   ;;  %s678_s22 = smov [#allocation11]   ;;  %s448_s27 = sshll.u32 %s810_s5, 4  ;;  %vm437_vm7 = vcmask 1041408   ;;  %s449_s27 = int_to_ptr.hbm [resolvable:$true] %s448_s27 }
  0x1b   :  { %s446_s23 = sshll.u32 %s678_s22, 4  ;;  %s447_s23 = int_to_ptr.vmem [resolvable:$true] %s446_s23 }
  0x1c   :  { %124 = vmatpush.bf16.msra.mxu0 %v473_v3 }
  0x1f   :  { %468 = vmatmul.msk.bf16.vlgmr.msra.gmra.mxu0 %vm113_vm0, %v96_v6 }
  0x20   :  { %197 = vrot.lane.b32.xlu0 %v132_v1, %s672_s4 }
  0x21   :  { %192 = vrot.lane.b32.xlu1 %v726_v2, %s671_s2 }
  0x28   :  { %136 = vrot.lane.b32.xlu0 %v132_v1, %s673_s19 }
  0x8a   :  { %v178_v7 = vpop.permute.xlu0 %177 }
  0x8b   :  { %v173_v18 = vpop.permute.xlu1 %172 }
  0x92   :  { %v198_v10 = vpop.permute.xlu0 %197 }
  0x93   :  { %v193_v20 = vpop.permute.xlu1 %192 }
  0x9a   :  { %v137_v15 = vpop.permute.xlu0 %136 }
  0x9c   :  { %v734_v8 = vpop.f32.mrf.mxu0 }
  0x9d   :  { %v180_v9 = vmul.f32 %v178_v7, %v734_v8  ;;  %v200_v12 = vmul.f32 %v198_v10, %v734_v8  ;;  %v139_v16 = vmul.f32 %v137_v15, %v734_v8  ;;  %v175_v21 = vmul.f32 %v173_v18, %v734_v8 }
  0x9e   :  { %v195_v22 = vmul.f32 %v193_v20, %v734_v8  ;;  %v157_v27 = vmul.f32 %v132_v1, %v734_v8  ;;  %v133_v44 = vmul.f32 %v726_v2, %v734_v8 }
  0x9f   :  { %184 = vrot.lane.b32.xlu2 %v180_v9, %s674_s20 }
  0xa4   :  { %v737_v11 = vpop.f32.mrf.mxu0 }
  0xa5   :  { %v181_v13 = vmul.f32 %v178_v7, %v737_v11  ;;  %v201_v14 = vmul.f32 %v198_v10, %v737_v11  ;;  %v140_v17 = vmul.f32 %v137_v15, %v737_v11  ;;  %v158_v28 = vmul.f32 %v132_v1, %v737_v11  ;;  %v234_v1 = vld [vmem:[#allocation10] sm:$0xff] }
  0xa6   :  { %v196_v30 = vmul.f32 %v193_v20, %v737_v11  ;;  %v176_v31 = vmul.f32 %v173_v18, %v737_v11  ;;  %v134_v59 = vmul.f32 %v726_v2, %v737_v11  ;;  %v299_v20 = vpack.c.bf16 %v737_v11, %v737_v11 }
  0xa7   :  { %204 = vrot.lane.b32.xlu2 %v200_v12, %s673_s19  ;;  %186 = vrot.lane.b32.xlu1 %v181_v13, %s674_s20  ;;  %v298_v12 = vpack.c.bf16 %v734_v8, %v734_v8 }
  0xa9   :  { %v301_v13 = vunpack.c.l.b16 %v298_v12 }
  0xaf   :  { %206 = vrot.lane.b32.xlu2 %v201_v14, %s673_s19  ;;  %152 = vrot.lane.b32.xlu1 %v726_v2, %s673_s19  ;;  %v302_v14 = vpack.c.b16 %v301_v13, %v301_v13 }
  0xb7   :  { %143 = vrot.lane.b32.xlu2 %v139_v16, %s674_s20 }
  0xbf   :  { %145 = vrot.lane.b32.xlu2 %v140_v17, %s674_s20 }
  0xf9   :  { %v185_v19 = vpop.permute.xlu2 %184 }
  0xfa   :  { %v190_v24 = vadd.f32 %v185_v19, %v175_v21  ;;  %v326_v21 = vunpack.c.l.b16 %v299_v20 }
 0x101   :  { %v205_v23 = vpop.permute.xlu2 %204 }
 0x102   :  { %v210_v25 = vsub.f32 %v195_v22, %v205_v23 }
 0x104   :  { %v492_v26 = vpack.i.bf16 %v210_v25, %v190_v24  ;;  %v327_v24 = vpack.c.b16 %v326_v21, %v326_v21 }
 0x106   :  { %493 = vrot.lane.b32.xlu0 %v492_v26, %s675_s21 }
 0x109   :  { %v207_v29 = vpop.permute.xlu2 %206 }
 0x10a   :  { %v211_v33 = vsub.f32 %v196_v30, %v207_v29 }
 0x10e   :  { %161 = vrot.lane.b32.xlu0 %v157_v27, %s673_s19 }
 0x111   :  { %v144_v42 = vpop.permute.xlu2 %143 }
 0x112   :  { %v149_v47 = vadd.f32 %v144_v42, %v133_v44 }
 0x116   :  { %163 = vrot.lane.b32.xlu0 %v158_v28, %s673_s19 }
 0x119   :  { %v187_v32 = vpop.permute.xlu1 %186  ;;  %v146_v57 = vpop.permute.xlu2 %145 }
 0x11a   :  { %v191_v34 = vadd.f32 %v187_v32, %v176_v31  ;;  %v150_v62 = vadd.f32 %v146_v57, %v134_v59 }
 0x11c   :  { %v497_v35 = vpack.i.bf16 %v211_v33, %v191_v34 }
 0x11e   :  { %498 = vrot.lane.b32.xlu1 %v497_v35, %s675_s21 }
 0x121   :  { %v153_v40 = vpop.permute.xlu1 %152 }
 0x122   :  { %v155_v45 = vmul.f32 %v153_v40, %v734_v8  ;;  %v156_v55 = vmul.f32 %v153_v40, %v737_v11 }
 0x178   :  { %v494_v36 = vpop.permute.xlu0 %493 }
 0x179   :  { %v496_v37 = vunpack.i.h.bf16 %v494_v36  ;;  %v495_v38 = vunpack.i.l.bf16 %v494_v36 }
 0x17b   :  { %v228_v39 = vsel %vm169_vm1, %v495_v38, %v496_v37 }
 0x17c   :  { %v232_v41 = vpack.c.bf16 %v228_v39, %v228_v39 }
 0x17e   :  { %v239_v43 = vsel %vm113_vm0, %v232_v41, 0  ;;  %v676_v41 = vmov 1983009808  }
 0x17f   :  { %248 = vmatpush.bf16.xpose.msra.mxu1 %v239_v43  ;;  %v353_v42 = vunpack.c.l.s4 %v676_v41 }
 0x180   :  { %v162_v46 = vpop.permute.xlu0 %161 }
 0x181   :  { %v167_v48 = vsub.f32 %v155_v45, %v162_v46  ;;  %v354_v44 = vunpack.c.0.s8 %v353_v42 }
 0x183   :  { %v170_v49 = vsel %vm169_vm1, %v149_v47, %v167_v48  ;;  %v677_v47 = vmov 1934713408  }
 0x184   :  { %v230_v50 = vpack.c.bf16 %v170_v49, %v170_v49  ;;  %v375_v48 = vunpack.c.l.s4 %v677_v47 }
 0x186   :  { %469 = vmatmul.msk.bf16.vlgmr.msra.gmra.mxu1 %vm113_vm0, %v230_v50 }
 0x188   :  { %v164_v54 = vpop.permute.xlu0 %163 }
 0x189   :  { %v168_v60 = vsub.f32 %v156_v55, %v164_v54 }
 0x18b   :  { %v171_v63 = vsel %vm169_vm1, %v150_v62, %v168_v60 }
 0x18c   :  { %v231_v0 = vpack.c.bf16 %v171_v63, %v171_v63 }
 0x190   :  { %v499_v51 = vpop.permute.xlu1 %498 }
 0x191   :  { %v501_v52 = vunpack.i.h.bf16 %v499_v51  ;;  %v500_v53 = vunpack.i.l.bf16 %v499_v51 }
 0x193   :  { %v229_v56 = vsel %vm169_vm1, %v500_v53, %v501_v52 }
 0x194   :  { %v233_v58 = vpack.c.bf16 %v229_v56, %v229_v56  ;;  %v376_v56 = vunpack.c.0.s8 %v375_v48 }
 0x196   :  { %v258_v61 = vsel %vm113_vm0, %v233_v58, 0 }
 0x197   :  { %267 = vmatpush.bf16.xpose.msra.mxu2 %v258_v61 }
 0x19e   :  { %470 = vmatmul.msk.bf16.vlgmr.msra.gmra.mxu2 %vm113_vm0, %v231_v0 }
 0x203   :  { %v250_v3 = vpop.f32.mrf.mxu1 }
 0x204   :  { %v251_v4 = vadd.f32 %v250_v3, %v234_v1 }
 0x206   :  { %v274_v5 = vsel %vm273_vm2, %v251_v4, -inf }
 0x207   :  { %275 = vmax.xlane.f32.xlu1 %v274_v5 }
 0x20b   :  { %v252_v6 = vpop.f32.mrf.mxu1 }
 0x221   :  { %v269_v7 = vpop.f32.mrf.mxu2 }
 0x222   :  { %v270_v2 = vadd.f32 %v269_v7, %v234_v1 }
 0x224   :  { %v277_v9 = vsel %vm273_vm2, %v270_v2, -inf }
 0x225   :  { %278 = vmax.xlane.f32.xlu2 %v277_v9 }
 0x229   :  { %v271_v10 = vpop.f32.mrf.mxu2 }
 0x23d   :  { %303 = vrot.lane.b32.xlu2 %v302_v14, %s663_s26 }
 0x27a   :  { %v276_v15 = vpop.xlane.xlu1 %275 }
 0x27b   :  { %v280_v16 = vsub.f32 %v251_v4, %v276_v15 }
 0x27d   :  { %v282_v17 = vmul.f32 1.442695, %v280_v16 }
 0x27f   :  { %502 = vpow2.f32 %v282_v17 }
 0x285   :  { %v503_v18 = vpop.eup %502 }
 0x286   :  { %v286_v19 = vsel %vm273_vm2, %v503_v18, 0.0 }
 0x287   :  { %287 = vadd.xlane.f32.xlu0 %v286_v19 }
 0x298   :  { %v279_v22 = vpop.xlane.xlu2 %278 }
 0x299   :  { %v281_v23 = vsub.f32 %v270_v2, %v279_v22 }
 0x29b   :  { %v284_v8 = vmul.f32 1.442695, %v281_v23  ;;  %328 = vrot.lane.b32.xlu0 %v327_v24, %s663_s26 }
 0x29d   :  { %504 = vpow2.f32 %v284_v8 }
 0x2a0   :  { %v304_v25 = vpop.permute.xlu2 %303 }
 0x2a1   :  { %v310_v26 = vsel %vm308_vm3, %v304_v25, 0 }
 0x2a2   :  { %319 = vmatpush.bf16.msra.mxu3 %v310_v26 }
 0x2a3   :  { %v505_v27 = vpop.eup %504 }
 0x2a4   :  { %v289_v28 = vsel %vm273_vm2, %v505_v27, 0.0 }
 0x2a5   :  { %290 = vadd.xlane.f32.xlu1 %v289_v28 }
 0x2fa   :  { %v288_v29 = vpop.xlane.xlu0 %287 }
 0x2fb   :  { %506 = vrcp.f32 %v288_v29 }
 0x301   :  { %v507_v30 = vpop.eup %506 }
 0x302   :  { %v294_v11 = vmul.f32 %v507_v30, %v503_v18 }
 0x304   :  { %v296_v31 = vpack.c.bf16 %v294_v11, %v294_v11 }
 0x306   :  { %471 = vmatmul.msk.bf16.vlgmr.msra.gmra.mxu3 %vm273_vm2, %v296_v31 }
 0x30d   :  { %v329_v32 = vpop.permute.xlu0 %328 }
 0x30e   :  { %v334_v33 = vsel %vm308_vm3, %v329_v32, 0 }
 0x30f   :  { %343 = vmatpush.bf16.msrb.mxu3 %v334_v33 }
 0x318   :  { %v291_v34 = vpop.xlane.xlu1 %290 }
 0x319   :  { %508 = vrcp.f32 %v291_v34 }
 0x31f   :  { %v509_v35 = vpop.eup %508 }
 0x320   :  { %v295_v36 = vmul.f32 %v509_v35, %v505_v27 }
 0x322   :  { %v297_v37 = vpack.c.bf16 %v295_v36, %v295_v36 }
 0x324   :  { %472 = vmatmul.msk.bf16.vlgmr.msrb.gmra.mxu3 %vm273_vm2, %v297_v37 }
 0x389   :  { %v321_v38 = vpop.f32.mrf.mxu3 }
 0x38a   :  { %v349_v40 = vrot.slane %v321_v38, 4  ;;  %v355_v49 = vperm.slane %v321_v38, %v354_v44 }
 0x38c   :  { %v351_v43 = vsel %vm350_vm4, 0.0, %v349_v40  ;;  %v372_v57 = vrot.slane %v355_v49, 4 }
 0x38d   :  { %v359_v45 = vperm.slane %v351_v43, %v354_v44 }
 0x38f   :  { %v384_v54 = vrot.slane %v359_v45, 4 }
 0x391   :  { %v323_v39 = vpop.f32.mrf.mxu3 }
 0x3a7   :  { %v345_v46 = vpop.f32.mrf.mxu3 }
 0x3a8   :  { %v360_v50 = vrot.slane %v345_v46, 4  ;;  %v365_v51 = vperm.slane %v345_v46, %v354_v44 }
 0x3aa   :  { %v361_v52 = vsel %vm350_vm4, 0.0, %v360_v50  ;;  %v370_v53 = vrot.slane %v365_v51, 4  ;;  %v373_v62 = vsel %vm350_vm4, %v365_v51, %v372_v57 }
 0x3ab   :  { %v369_v55 = vperm.slane %v361_v52, %v354_v44  ;;  %v381_v6 = vperm.slane %v373_v62, %v376_v56 }
 0x3ac   :  { %v371_v58 = vsel %vm350_vm4, %v370_v53, %v355_v49 }
 0x3ad   :  { %v382_v59 = vrot.slane %v369_v55, 4  ;;  %v385_v60 = vsel %vm350_vm4, %v369_v55, %v384_v54  ;;  %v377_v61 = vperm.slane %v371_v58, %v376_v56  ;;  %v396_v10 = vrot.slane %v381_v6, 4 }
 0x3ae   :  { %v393_v63 = vperm.slane %v385_v60, %v376_v56 }
 0x3af   :  { %v347_v0 = vpop.f32.mrf.mxu3  ;;  %v394_v1 = vrot.slane %v377_v61, 4  ;;  %v383_v3 = vsel %vm350_vm4, %v382_v59, %v359_v45  ;;  %v397_v13 = vsel %vm350_vm4, 0.0, %v396_v10 }
 0x3b0   :  { %419 = vrot.lane.b32.xlu2 %v393_v63, %s663_s26  ;;  %v389_v4 = vperm.slane %v383_v3, %v376_v56  ;;  %v400_v2 = vrot.slane %v393_v63, 4 }
 0x3b1   :  { %v395_v5 = vsel %vm350_vm4, 0.0, %v394_v1 }
 0x3b2   :  { %403 = vrot.lane.b32.xlu0 %v395_v5, %s672_s4  ;;  %v398_v7 = vrot.slane %v389_v4, 4  ;;  %v401_v12 = vsel %vm350_vm4, 0.0, %v400_v2 }
 0x3b4   :  { %v399_v9 = vsel %vm350_vm4, 0.0, %v398_v7 }
 0x3b5   :  { %415 = vrot.lane.b32.xlu1 %v399_v9, %s672_s4 }
 0x3b8   :  { %423 = vrot.lane.b32.xlu2 %v401_v12, %s675_s21 }
 0x3ba   :  { %411 = vrot.lane.b32.xlu0 %v397_v13, %s675_s21 }
 0x3bd   :  { %407 = vrot.lane.b32.xlu1 %v381_v6, %s663_s26 }
 0x40a   :  { %v420_v14 = vpop.permute.xlu2 %419 }
 0x412   :  { %v424_v19 = vpop.permute.xlu2 %423 }
 0x424   :  { %v404_v15 = vpop.permute.xlu0 %403 }
 0x425   :  { %v426_v21 = vsel %vm113_vm0, %v377_v61, %v404_v15 }
 0x427   :  { %v416_v16 = vpop.permute.xlu1 %415 }
 0x428   :  { %v431_v17 = vsel %vm113_vm0, %v389_v4, %v416_v16 }
 0x429   :  { %v432_v18 = vsel %vm427_vm5, %v431_v17, %v420_v14 }
 0x42a   :  { %v433_v20 = vsel %vm429_vm6, %v432_v18, %v424_v19 }
 0x42b   :  { %v436_v23 = vrot.slane %v433_v20, 6 }
 0x42c   :  { %v412_v24 = vpop.permute.xlu0 %411 }
 0x42f   :  { %v408_v22 = vpop.permute.xlu1 %407 }
 0x430   :  { %v428_v8 = vsel %vm427_vm5, %v426_v21, %v408_v22 }
 0x431   :  { %v430_v25 = vsel %vm429_vm6, %v428_v8, %v412_v24 }
 0x432   :  { %v438_v26 = vsel %vm437_vm7, %v430_v25, %v436_v23 }
 0x433   :  { %440 = vst [vmem:[#allocation11] sm:$0xf] %v438_v26 }
 0x434   :  { %451 = dma.vmem_to_hbm [thread:$0]  %s447_s23, 64, %s449_s27, [#allocation4]  }
 0x435   :  { %660 = dma.done.wait [#allocation4], 64  }
 0x436   :  { %661 = vsyncadd [#allocation4], 4294967232 }
 0x437   :  { %456 = vsyncpa [#allocation3], 1 }
 0x438   :  { %457 = vsyncpa [#allocation6], 1 }
 0x439   :  { %458 = vsyncpa [#allocation9], 1 }
 0x43a   :  { %459 = vsyncpa [#allocation4], 1 }

</bundles_post_ra>
